<compile_context>
chip_gen: v6e
topology: v6e:2x2x1
jax: 0.10.0
libtpu: 0.0.40
codegen_flags: <defaults>
</compile_context>

<pallas_src>
import jax
import jax.numpy as jnp
from jax import lax
from jax.experimental import pallas as pl
from jax.experimental.pallas import tpu as pltpu


def _round_up(x, m):
    return (x + m - 1) // m * m


def _make_kernel(B, T, A, BB):
    """Build the per-block kernel. One grid step == BB batch rows (lane-dense T*A)."""
    TA = T * A
    inv_A = 1.0 / A

    def kernel(gen_ref, w_ref, r_ref, score_ref):
        # Upcast once; all reductions/accumulation stay in f32 even for bf16 inputs.
        w = w_ref[...].astype(jnp.float32)                  # (BB, T*A), lane-dense
        mask = (gen_ref[...] > 0).astype(jnp.float32)       # (BB, T)

        # Expand mask to the flat layout with one small MXU matmul against the 0/1
        # expander R[t, t*A + a] = 1. Exact regardless of matmul precision.
        mask_flat = jnp.dot(mask, r_ref[...],
                            preferred_element_type=jnp.float32)   # (BB, T*A)
        wm = w * mask_flat                                   # (BB, T*A)

        # Per-region sums s[b, a] = sum_t wm[b, t*A + a]: exact f32 roll-tree over the
        # stride-A lane cosets (rolls ride the XLU slot, adds the VALU slot).
        acc = wm
        if T > 1:
            if T & (T - 1) == 0:             # power-of-two T: log2(T) passes
                step = 1
                while step < T:
                    acc = acc + pltpu.roll(acc, step * A, axis=1)
                    step *= 2
            else:                            # exact fallback: T-1 passes
                # TODO(synk): for large non-power-of-two T use a binary-decomposition
                # roll-tree instead of this O(T) fallback.
                rolled = wm
                for _ in range(T - 1):
                    rolled = pltpu.roll(rolled, A, axis=1)
                    acc = acc + rolled
        s = acc[:, :A]                                       # (BB, A) region sums

        # Total masked attention mass, clamped at 1 (derived from s: small reduce only).
        weight_num = jnp.maximum(jnp.sum(s, axis=-1, keepdims=True), 1.0)  # (BB, 1)

        r = inv_A - s / weight_num                           # (BB, A)
        score = jnp.sum(r * r, axis=-1, keepdims=True)       # (BB, 1)

        # Zero ragged-tail rows (their stores are dropped by Pallas anyway; this also
        # guards against garbage in the partial-block read of the tail).
        row = pl.program_id(0) * BB + lax.broadcasted_iota(jnp.int32, (BB, 1), 0)
        score_ref[...] = jnp.where(row < B, score, 0.0)

        # TODO(synk): original code has a pdb NaN-trap (att_reward.sum() != itself);
        # no in-kernel equivalent (pl.debug_check could approximate it).

    return kernel


def attention_criterion(weights_p, gen_result, *,
                        vmem_budget_bytes=40 * 1024 * 1024):
    """weights_p: (B, T, A) float32/bfloat16, gen_result: (B, T) int tokens -> scalar loss."""
    B, T, A = weights_p.shape
    TA = T * A

    # Accept bf16 weights directly (halves HBM read traffic); upcast happens in-kernel.
    if weights_p.dtype not in (jnp.float32, jnp.bfloat16):
        weights_p = weights_p.astype(jnp.float32)
    gen_result = gen_result.astype(jnp.int32)

    # Lane-dense view of the weights: (B, T*A). For a contiguous row-major array this is
    # a free (bitcast) reshape -- no extra HBM traffic.
    w_flat = weights_p.reshape(B, TA)

    # 0/1 expander matrix R[t, t*A + a] = 1: broadcasts the (BB, T) word-exist mask to
    # the flat (BB, T*A) layout on the otherwise-idle MXU. Resident (constant index_map).
    r_mat = jnp.repeat(jnp.eye(T, dtype=jnp.float32), A, axis=1)   # (T, T*A)

    # --- pick the batch-block size BB from the VMEM budget ---------------------------
    LANE, SUB = 128, 16          # 16 sublanes also covers bf16 (16, 128) tile packing
    itemsize = jnp.dtype(weights_p.dtype).itemsize
    w_row = _round_up(TA, LANE) * itemsize
    g_row = _round_up(T, LANE) * 4
    o_row = LANE * 4
    per_row = 2 * (w_row + g_row + o_row)                 # x2: double-buffered pipeline
    r_bytes = 2 * _round_up(T, 8) * _round_up(TA, LANE) * 4
    avail = max(vmem_budget_bytes - r_bytes, per_row * SUB)
    bb_cap = max(SUB, (avail // per_row) // SUB * SUB)
    BB = int(min(_round_up(B, SUB), bb_cap))
    # Keep >= 2 grid blocks when possible so v7x can shard the parallel axis across its
    # 2 TensorCores (costs nothing on single-core v5e/v6e).
    if B > SUB:
        BB = min(BB, _round_up(pl.cdiv(B, 2), SUB))
    BB = max(BB, SUB)
    num_blocks = pl.cdiv(B, BB)

    scores = pl.pallas_call(
        _make_kernel(B, T, A, BB),
        out_shape=jax.ShapeDtypeStruct((B, 1), jnp.float32),
        grid_spec=pltpu.PrefetchScalarGridSpec(
            num_scalar_prefetch=0,
            grid=(num_blocks,),
            in_specs=[
                pl.BlockSpec((BB, T), lambda b: (b, 0)),      # gen tokens (mask source)
                pl.BlockSpec((BB, TA), lambda b: (b, 0)),     # lane-dense weights slab
                pl.BlockSpec((T, TA), lambda b: (0, 0)),      # resident mask expander R
            ],
            out_specs=pl.BlockSpec((BB, 1), lambda b: (b, 0)),  # per-row scores
        ),
        compiler_params=pltpu.CompilerParams(
            # No cross-step state -> both TensorCores on v7x can take grid blocks.
            dimension_semantics=("parallel",),
            # Above the 16/32 MiB scoped defaults (v5e/v6e), below v7x's 64 MiB ceiling.
            vmem_limit_bytes=int(vmem_budget_bytes + (8 << 20)),
        ),
    )(gen_result, w_flat, r_mat)

    # Mean over the *true* batch size (tail-block rows zeroed / stores dropped).
    return jnp.sum(scores) / B


def _reference(weights_p, gen_result):
    """Plain-JAX reference mirroring the PyTorch module."""
    B, T, A = weights_p.shape
    word_exist = (gen_result > 0).astype(jnp.float32).reshape(B, T, 1)
    w = weights_p.astype(jnp.float32) * word_exist
    weight_num = w.sum(axis=2).sum(axis=1, keepdims=True)        # (B, 1)
    weight_num = jnp.where(weight_num < 1.0, 1.0, weight_num)
    att_reward = 1.0 / A - w.sum(axis=1) / weight_num            # (B, A)
    att_reward = att_reward * att_reward
    att_score = att_reward.sum(axis=1)                           # (B,)
    return att_score.mean()


if __name__ == "__main__":
    key = jax.random.PRNGKey(0)
    kw, kg = jax.random.split(key)

    B, T, A = 2, 8, 16

    # Deterministic synthetic "model.weights_p": attention-like weights (softmax over regions).
    logits = jax.random.normal(kw, (B, T, A), dtype=jnp.float32)
    weights_p = jax.nn.softmax(logits, axis=-1)

    # Deterministic synthetic gen_result: token ids with some zeros (padding / EOS).
    gen_result = jax.random.randint(kg, (B, T), minval=0, maxval=5, dtype=jnp.int32)

    loss = attention_criterion(weights_p, gen_result)
    loss = jax.block_until_ready(loss)

    ref = _reference(weights_p, gen_result)
    assert jnp.allclose(loss, ref, rtol=1e-5, atol=1e-6), (loss, ref)

    print("KERNEL_OK")
</pallas_src>

<mosaic_0001>
module attributes {stable_mosaic.version = 11 : i64} {
  func.func @kernel(%arg0: i32, %arg1: memref<16x8xi32, #tpu.memory_space<vmem>>, %arg2: memref<16x128xf32, #tpu.memory_space<vmem>>, %arg3: memref<8x128xf32, #tpu.memory_space<vmem>>, %arg4: memref<16x1xf32, #tpu.memory_space<vmem>>) attributes {dimension_semantics = [#tpu.dimension_semantics<parallel>], iteration_bounds = array<i64: 1>, scalar_prefetch = 0 : i64, scratch_operands = 0 : i64, tpu.core_type = #tpu.core_type<tc>, window_params = [{transform_indices = @transform_0, window_bounds = array<i64: 16, 8>}, {transform_indices = @transform_1, window_bounds = array<i64: 16, 128>}, {pipeline_mode = #tpu.pipeline_mode<synchronous>, transform_indices = @transform_2, window_bounds = array<i64: 8, 128>}, {transform_indices = @transform_3, window_bounds = array<i64: 16, 1>}]} {
    %c0 = arith.constant 0 : index
    %c0_0 = arith.constant 0 : index
    %0 = vector.load %arg2[%c0, %c0_0] : memref<16x128xf32, #tpu.memory_space<vmem>>, vector<16x128xf32>
    %c0_1 = arith.constant 0 : index
    %c0_2 = arith.constant 0 : index
    %1 = vector.load %arg1[%c0_1, %c0_2] : memref<16x8xi32, #tpu.memory_space<vmem>>, vector<16x8xi32>
    %c0_i32 = arith.constant 0 : i32
    %2 = vector.broadcast %c0_i32 : i32 to vector<16x8xi32>
    %3 = arith.cmpi sgt, %1, %2 : vector<16x8xi32>
    %4 = arith.extui %3 : vector<16x8xi1> to vector<16x8xi32>
    %5 = arith.sitofp %4 : vector<16x8xi32> to vector<16x8xf32>
    %c0_3 = arith.constant 0 : index
    %c0_4 = arith.constant 0 : index
    %6 = vector.load %arg3[%c0_3, %c0_4] : memref<8x128xf32, #tpu.memory_space<vmem>>, vector<8x128xf32>
    %cst = arith.constant dense<0.000000e+00> : vector<16x128xf32>
    %7 = tpu.matmul %5, %6, %cst {dimension_numbers = #tpu.dot_dimension_numbers<[1], [0], [0], [1], [0, 0, 1, 1], [], []>} : vector<16x8xf32>, vector<8x128xf32>, vector<16x128xf32> -> vector<16x128xf32>
    %8 = arith.mulf %0, %7 : vector<16x128xf32>
    %c16_i32 = arith.constant 16 : i32
    %9 = tpu.dynamic_rotate %8 by %c16_i32 dim 1 : vector<16x128xf32>, i32 -> vector<16x128xf32>
    %10 = arith.addf %8, %9 : vector<16x128xf32>
    %c32_i32 = arith.constant 32 : i32
    %11 = tpu.dynamic_rotate %10 by %c32_i32 dim 1 : vector<16x128xf32>, i32 -> vector<16x128xf32>
    %12 = arith.addf %10, %11 : vector<16x128xf32>
    %c64_i32 = arith.constant 64 : i32
    %13 = tpu.dynamic_rotate %12 by %c64_i32 dim 1 : vector<16x128xf32>, i32 -> vector<16x128xf32>
    %14 = arith.addf %12, %13 : vector<16x128xf32>
    %15 = vector.extract_strided_slice %14 {offsets = [0, 0], sizes = [16, 16], strides = [1, 1]} : vector<16x128xf32> to vector<16x16xf32>
    %cst_5 = arith.constant dense<0.000000e+00> : vector<16xf32>
    %16 = vector.multi_reduction <add>, %15, %cst_5 [1] : vector<16x16xf32> to vector<16xf32>
    %17 = vector.shape_cast %16 : vector<16xf32> to vector<16x1xf32>
    %cst_6 = arith.constant 1.000000e+00 : f32
    %18 = vector.broadcast %cst_6 : f32 to vector<16x1xf32>
    %19 = arith.maximumf %17, %18 : vector<16x1xf32>
    %20 = vector.broadcast %19 : vector<16x1xf32> to vector<16x16xf32>
    %21 = arith.divf %15, %20 : vector<16x16xf32>
    %cst_7 = arith.constant 6.250000e-02 : f32
    %22 = vector.broadcast %cst_7 : f32 to vector<16x16xf32>
    %23 = arith.subf %22, %21 : vector<16x16xf32>
    %24 = arith.mulf %23, %23 : vector<16x16xf32>
    %cst_8 = arith.constant dense<0.000000e+00> : vector<16xf32>
    %25 = vector.multi_reduction <add>, %24, %cst_8 [1] : vector<16x16xf32> to vector<16xf32>
    %26 = vector.shape_cast %25 : vector<16xf32> to vector<16x1xf32>
    %c16_i32_9 = arith.constant 16 : i32
    %27 = arith.muli %arg0, %c16_i32_9 : i32
    %28 = tpu.iota {dimensions = array<i32: 0>} : vector<16x1xi32>
    %29 = vector.broadcast %27 : i32 to vector<16x1xi32>
    %30 = arith.addi %29, %28 : vector<16x1xi32>
    %c2_i32 = arith.constant 2 : i32
    %31 = vector.broadcast %c2_i32 : i32 to vector<16x1xi32>
    %32 = arith.cmpi slt, %30, %31 : vector<16x1xi32>
    %cst_10 = arith.constant 0.000000e+00 : f32
    %33 = vector.broadcast %cst_10 : f32 to vector<16x1xf32>
    %34 = arith.select %32, %26, %33 : vector<16x1xi1>, vector<16x1xf32>
    %c0_11 = arith.constant 0 : index
    %c0_12 = arith.constant 0 : index
    %35 = vector.load %arg4[%c0_11, %c0_12] : memref<16x1xf32, #tpu.memory_space<vmem>>, vector<16x1xf32>
    tpu.vector_store %arg4[%c0_11, %c0_12], %34 {strides = array<i32>} : memref<16x1xf32, #tpu.memory_space<vmem>>, vector<16x1xf32>,
    return
  }
  func.func @transform_0(%arg0: i32) -> (i32, i32) {
    %c0_i32 = arith.constant 0 : i32
    %c0_i32_0 = arith.constant 0 : i32
    return %arg0, %c0_i32 : i32, i32
  }
  func.func @transform_1(%arg0: i32) -> (i32, i32) {
    %c0_i32 = arith.constant 0 : i32
    %c0_i32_0 = arith.constant 0 : i32
    return %arg0, %c0_i32 : i32, i32
  }
  func.func @transform_2(%arg0: i32) -> (i32, i32) {
    %c0_i32 = arith.constant 0 : i32
    %c0_i32_0 = arith.constant 0 : i32
    %c0_i32_1 = arith.constant 0 : i32
    return %c0_i32, %c0_i32_0 : i32, i32
  }
  func.func @transform_3(%arg0: i32) -> (i32, i32) {
    %c0_i32 = arith.constant 0 : i32
    %c0_i32_0 = arith.constant 0 : i32
    return %arg0, %c0_i32 : i32, i32
  }
}

</mosaic_0001>

<bundles_post_ra>
// kernel: tpu_custom_call.1
= control target key start
LH: loop header
LB: loop body
LE: loop exit
PB: predicated region body
PF: predicated region fallthrough
CT: control target
= control target key end

     0   :  { %8 = vsyncpa [#allocation3], 0  ;;  %s378_s0 = inlined_call_operand.hbm [shape: s32[2,8], index: 0, kind: input, shape index: {}]   ;;  %s379_s1 = inlined_call_operand.hbm [shape: f32[2,128], index: 1, kind: input, shape index: {}]   ;;  %s380_s2 = inlined_call_operand.hbm [shape: f32[8,128], index: 2, kind: input, shape index: {}]   ;;  %s381_s3 = inlined_call_operand.vmem [shape: f32[2,1], index: 3, kind: output, shape index: {}]  }
   0x1   :  { %9 = vsyncpa [#allocation5], 0 }
   0x2   :  { %14 = vsyncadd [#allocation3], 224  ;;  %s332_s12 = smov [#allocation2]  }
   0x3   :  { %s15_s13 = sshll.u32 %s332_s12, 4  ;;  %s16_s13 = int_to_ptr.vmem [resolvable:$true] %s15_s13 }
   0x4   :  { %s276_s14 = scalar_lea.vmem %s16_s13, 32  ;;  %s280_s15 = scalar_lea.vmem %s16_s13, 256 }
   0x5   :  { %p277_p0 = scmp.ne.s32.totalorder %s16_s13, %s276_s14  ;;  %p281_p1 = scmp.lt.s32.totalorder %s16_s13, %s16_s13 }
   0x6   :  { %p282_p2 = scmp.lt.s32.totalorder %s280_s15, %s276_s14 }
   0x8   :  { %p283_p3 = por %p282_p2, %p281_p1 }
   0xa   :  { %p284_p4 = pnand %p283_p3, %p277_p0 }
   0xc   :  { %287 = shalt.err (!%p284_p4)
}
   0xd   :  { %s333_s16 = smov 32   ;;  %s334_s17 = smov 2  }
   0xe   :  { %21 = dma.hbm_to_vmem [thread:$0]  %s378_s0, 32, %s16_s13, [#allocation3], %s333_s16, %s333_s16, %s334_s17  }
   0xf   :  { %26 = vsyncadd [#allocation5], 224  ;;  %s335_s20 = smov [#allocation4]   ;;  %s336_s22 = smov [#allocation6]  }
  0x10   :  { %s27_s21 = sshll.u32 %s335_s20, 4  ;;  %s40_s23 = sshll.u32 %s336_s22, 4  ;;  %s28_s21 = int_to_ptr.vmem [resolvable:$true] %s27_s21  ;;  %s41_s23 = int_to_ptr.vmem [resolvable:$true] %s40_s23 }
  0x11   :  { %s296_s24 = scalar_lea.vmem %s28_s21, 32  ;;  %s300_s25 = scalar_lea.vmem %s28_s21, 256 }
  0x12   :  { %p297_p5 = scmp.ne.s32.totalorder %s28_s21, %s296_s24  ;;  %p301_p6 = scmp.lt.s32.totalorder %s28_s21, %s28_s21 }
  0x13   :  { %p302_p7 = scmp.lt.s32.totalorder %s300_s25, %s296_s24 }
  0x15   :  { %p303_p8 = por %p302_p7, %p301_p6 }
  0x17   :  { %p304_p9 = pnand %p303_p8, %p297_p5 }
  0x19   :  { %307 = shalt.err (!%p304_p9)
}
  0x1a   :  { %33 = dma.hbm_to_vmem [thread:$0]  %s379_s1, 32, %s28_s21, [#allocation5], %s333_s16, %s333_s16, %s334_s17  }
  0x1b   :  { %s316_s0 = scalar_lea.vmem %s41_s23, 128  ;;  %p321_p11 = scmp.lt.s32.totalorder %s41_s23, %s41_s23 }
  0x1c   :  { %p317_p10 = scmp.ne.s32.totalorder %s41_s23, %s316_s0  ;;  %p322_p12 = scmp.lt.s32.totalorder %s316_s0, %s316_s0 }
  0x1e   :  { %p323_p13 = por %p322_p12, %p321_p11 }
  0x20   :  { %p324_p0 = pnand %p323_p13, %p317_p10 }
  0x22   :  { %327 = shalt.err (!%p324_p0)
}
  0x23   :  { %43 = dma.hbm_to_vmem [thread:$0]  %s380_s2, 128, %s41_s23, [#allocation5]  }
  0x24   :  { %328 = dma.done.wait [#allocation3], 256  }
  0x25   :  { %329 = vsyncadd [#allocation3], 4294967040 }
  0x26   :  { %330 = dma.done.wait [#allocation5], 384  }
  0x27   :  { %331 = vsyncadd [#allocation5], 4294966912  ;;  %vm200_vm0 = vcmask 7168   ;;  %v63_v0 = vld [vmem:[#allocation6] sm:$0xff]  ;;  %vm64_vm1 = vcmask 64512   ;;  %v56_v2 = vld [vmem:[#allocation2 + $0x8] sm:$0xff]  ;;  %v190_v24 = vlaneseq }
  0x28   :  { %v55_v1 = vld [vmem:[#allocation2] sm:$0xff]  ;;  %253 = vmatprep.subr.mxu0 %v63_v0  ;;  %vm58_vm3 = vcmp.gt.s32.totalorder %v56_v2, 0  ;;  %v337_v3 = vmov 0.0   ;;  %v53_v7 = vld [vmem:[#allocation4] sm:$0xff]  ;;  %s338_s1 = smov 16   ;;  %s339_s2 = smov 64  }
  0x29   :  { %vm57_vm2 = vcmp.gt.s32.totalorder %v55_v1, 0  ;;  %254 = vmatpush3.msra.mxu0 %v63_v0  ;;  %v247_v5 = vsel %vm58_vm3, 1.0, %v337_v3  ;;  %vm166_vm4 = vcmask 130048   ;;  %v191_v25 = vshrl.u32 %v190_v24, 7 }
  0x2a   :  { %v246_v4 = vsel %vm57_vm2, 1.0, %v337_v3 }
  0x2b   :  { %255 = vmatprep.mubr.msk.f32.mxu0 %vm64_vm1, %v246_v4  ;;  %vm196_vm5 = vcmp.lt.s32.totalorder %v191_v25, 2 }
  0x2c   :  { %256 = vmatmul.mubr.msk.f32.vlgmr.msra.gmra.mxu0 %vm64_vm1, %v247_v5 }
  0xec   :  { %v257_v6 = vpop.f32.mrf.mxu0 }
  0xee   :  { %v137_v8 = vpop.f32.mrf.mxu0 }
  0xef   :  { %v146_v9 = vmul.f32 %v137_v8, %v53_v7 }
  0xf1   :  { %148 = vrot.lane.b32.xlu0 %v146_v9, %s338_s1 }
 0x163   :  { %v149_v10 = vpop.permute.xlu0 %148 }
 0x164   :  { %v152_v11 = vadd.f32 %v149_v10, %v146_v9 }
 0x166   :  { %154 = vrot.lane.b32.xlu0 %v152_v11, %s333_s16 }
 0x1d8   :  { %v155_v12 = vpop.permute.xlu0 %154 }
 0x1d9   :  { %v158_v13 = vadd.f32 %v155_v12, %v152_v11 }
 0x1db   :  { %160 = vrot.lane.b32.xlu1 %v158_v13, %s339_s2 }
 0x24d   :  { %v161_v14 = vpop.permute.xlu1 %160 }
 0x24e   :  { %v164_v15 = vadd.f32 %v161_v14, %v158_v13 }
 0x250   :  { %v167_v16 = vsel %vm166_vm4, %v164_v15, 0.0 }
 0x251   :  { %168 = vadd.xlane.f32.xlu1 %v167_v16 }
 0x2da   :  { %v169_v17 = vpop.xlane.xlu1 %168 }
 0x2db   :  { %v173_v18 = vmax.f32 %v169_v17, 1.0 }
 0x2dd   :  { %266 = vrcp.f32 %v173_v18 }
 0x2ea   :  { %v267_v19 = vpop.eup %266 }
 0x2eb   :  { %v176_v20 = vmul.f32 %v267_v19, %v164_v15 }
 0x2ed   :  { %v179_v21 = vsub.f32 0.0625, %v176_v20 }
 0x2ef   :  { %v181_v22 = vmul.f32 %v179_v21, %v179_v21 }
 0x2f1   :  { %v183_v23 = vsel %vm166_vm4, %v181_v22, 0.0 }
 0x2f2   :  { %184 = vadd.xlane.f32.xlu0 %v183_v23 }
 0x37b   :  { %v185_v26 = vpop.xlane.xlu0 %184 }
 0x37c   :  { %v198_v27 = vsel %vm196_vm5, %v185_v26, 0.0 }
 0x37d   :  { %201 = vst.msk [vmem:[#allocation7] sm:$0xff] %vm200_vm0, %v198_v27 }
 0x384   :  { %v221_v28 = vld [vmem:[#allocation7] sm:$0x3] }
 0x385   :  { %222 = vst [vmem:[%s381_s3] sm:$0x3] %v221_v28 }
 0x386   :  { %240 = vsyncpa [#allocation3], 1 }
 0x387   :  { %241 = vsyncpa [#allocation5], 1 }

</bundles_post_ra>
